<compile_context>
chip_gen: v7x
topology: tpu7x:2x2x1
jax: 0.10.0
libtpu: 0.0.40
codegen_flags: <defaults>
</compile_context>

<pallas_src>
import functools

import numpy as np
import jax
import jax.numpy as jnp
from jax import lax
from jax.experimental import pallas as pl
from jax.experimental.pallas import tpu as pltpu


# ---------------------------------------------------------------------------
# Hardware-aware sizing helpers
# ---------------------------------------------------------------------------
def _vmem_capacity_bytes():
    try:
        info = pltpu.get_tpu_info()
        return int(getattr(info, "vmem_capacity_bytes", 64 * 1024 * 1024))
    except Exception:
        return 64 * 1024 * 1024


def _vmem_limit_bytes():
    cap = _vmem_capacity_bytes()
    return max(32 * 1024 * 1024, min(cap - 12 * 1024 * 1024, 116 * 1024 * 1024))


def _round_up(v, m):
    return ((v + m - 1) // m) * m


def _pick_tile_rows(H, W, cx, cl, c48, cm, max_tile_rows=None):
    """Largest row tile (multiple of 8) whose K1 working set fits the per-core
    VMEM budget (v7x: 64 MiB/TC, v5e/v6e: 128 MiB).  Footprint covers the
    2-slot halo DMA buffers, masked activation values, the kw-concatenated MXU
    slab, the f32 accumulator/epilogue and the double-buffered output block."""
    wp2 = W + 2
    wp8 = _round_up(W + 2, 8)
    per_row = (
        2 * wp2 * cx * 2          # x_up halo buffer, 2 slots (bf16)
        + 2 * wp8 * cl * 2        # low halo buffer, 2 slots (bf16)
        + wp2 * cx * 2            # masked x_up value (bf16)
        + wp8 * cl * 2            # low value (bf16)
        + W * 3 * (cx + c48) * 2  # kw-concatenated MXU slab (bf16)
        + wp8 * c48 * 6           # low_f in f32 + bf16
        + 2 * W * cm * 4          # f32 accumulator + epilogue
        + 2 * W * cm * 2          # double-buffered output block (bf16)
    )
    fixed = 8 * 1024 * 1024       # folded weights (double-buffered) + misc scratch
    budget = _vmem_limit_bytes() - fixed
    tr = budget // max(per_row, 1)
    tr = min(tr, 256, _round_up(H, 8))
    if max_tile_rows is not None:
        tr = min(tr, max_tile_rows)
    return max(8, (int(tr) // 8) * 8)


# ---------------------------------------------------------------------------
# K0: bilinear resize (align_corners=True), row-tiled, bf16 MXU matmuls
# ---------------------------------------------------------------------------
def _resize_kernel(ah_ref, aw_ref, x_ref, o_ref, *, chunk):
    TRk, W, CX = o_ref.shape[1], o_ref.shape[2], o_ref.shape[3]
    Wi = aw_ref.shape[1]

    # Height pass: one 2D bf16 matmul; channels stay packed on lanes.
    t = jnp.dot(ah_ref[...], x_ref[0], preferred_element_type=jnp.float32)
    t3 = t.astype(jnp.bfloat16).reshape(TRk, Wi, CX)

    # Width pass: batched bf16 matmul over fixed-size row chunks.  The Aw
    # broadcast is hoisted out of the loop (JAX does not CSE broadcast_in_dim).
    awb = jnp.broadcast_to(aw_ref[...], (chunk, W, Wi))
    for h0 in range(0, TRk, chunk):
        u = lax.dot_general(awb, t3[h0:h0 + chunk],
                            dimension_numbers=(((2,), (1,)), ((0,), (0,))),
                            preferred_element_type=jnp.float32)
        o_ref[0, h0:h0 + chunk, :, :] = u.astype(o_ref.dtype)


def _bilinear_matrix(out_size, in_size):
    """1-D bilinear interpolation matrix, align_corners=True (PyTorch)."""
    A = np.zeros((out_size, in_size), np.float32)
    if out_size == 1 or in_size == 1:
        A[:, 0] = 1.0
        return A
    coords = np.arange(out_size) * (in_size - 1) / (out_size - 1)
    lo = np.clip(np.floor(coords).astype(np.int64), 0, in_size - 2)
    frac = (coords - lo).astype(np.float32)
    for i in range(out_size):
        A[i, lo[i]] += 1.0 - frac[i]
        A[i, lo[i] + 1] += frac[i]
    return A


def bilinear_resize(x_nhwc, Ah, Aw, TR):
    """x (N,Hi,Wi,C) bf16 -> (N,Hp,Wo,C) bf16 (rows >= true H are zero because
    the height matrix is zero-extended by the caller)."""
    N, Hi, Wi, C = x_nhwc.shape
    Hp, Wo = Ah.shape[0], Aw.shape[0]
    x_r = x_nhwc.reshape(N, Hi, Wi * C)
    return pl.pallas_call(
        functools.partial(_resize_kernel, chunk=min(8, TR)),
        out_shape=jax.ShapeDtypeStruct((N, Hp, Wo, C), jnp.bfloat16),
        grid=(N, Hp // TR),
        in_specs=[
            pl.BlockSpec((TR, Hi), lambda n, t: (t, 0)),
            pl.BlockSpec((Wo, Wi), lambda n, t: (0, 0)),
            pl.BlockSpec((1, Hi, Wi * C), lambda n, t: (n, 0, 0)),
        ],
        out_specs=pl.BlockSpec((1, TR, Wo, C), lambda n, t: (n, t, 0, 0)),
        compiler_params=pltpu.CompilerParams(
            dimension_semantics=("parallel", "arbitrary"),
            vmem_limit_bytes=_vmem_limit_bytes()),
    )(Ah, Aw, x_r)


# ---------------------------------------------------------------------------
# K1: fused [1x1 conv+BN+ReLU on low] + 3x3 conv + BN + ReLU, row-tiled,
#     double-buffered halo DMA, per-kh concatenated MXU contractions (K=912).
# ---------------------------------------------------------------------------
def _k1_kernel(xup_hbm, low_hbm, w_ref, w1_ref, b1_ref, b0_ref, o_ref,
               xbuf, lbuf, slab, sem, *, h_valid, mask_tail):
    n = pl.program_id(0)
    i = pl.program_id(1)
    nt = pl.num_programs(1)

    TRp2, Wp2, CX = xbuf.shape[1], xbuf.shape[2], xbuf.shape[3]
    Wp8, CL = lbuf.shape[2], lbuf.shape[3]
    TR, W = TRp2 - 2, Wp2 - 2
    C48 = w1_ref.shape[1]
    CC = w_ref.shape[1]                      # 3*CX + 3*C48
    CM = o_ref.shape[3]
    slot = lax.rem(i, 2)

    # ---- manual halo DMA (2-slot double buffer, prefetch of tile i+1) ------
    def _copies(tile, dst_slot, kind):
        if kind == 0:      # body rows
            src, rows, dst = tile * TR, TR, 1
        elif kind == 1:    # top halo row
            src, rows, dst = tile * TR - 1, 1, 0
        else:              # bottom halo row
            src, rows, dst = tile * TR + TR, 1, TR + 1
        cx = pltpu.make_async_copy(
            xup_hbm.at[n, pl.ds(src, rows)],
            xbuf.at[dst_slot, pl.ds(dst, rows), pl.ds(1, W), :],
            sem.at[dst_slot, 0, kind])
        cl = pltpu.make_async_copy(
            low_hbm.at[n, pl.ds(src, rows)],
            lbuf.at[dst_slot, pl.ds(dst, rows), pl.ds(1, W), :],
            sem.at[dst_slot, 1, kind])
        return cx, cl

    def _issue(tile, dst_slot, start):
        def go(kind):
            for c in _copies(tile, dst_slot, kind):
                c.start() if start else c.wait()
        go(0)
        @pl.when(tile > 0)
        def _(): go(1)
        @pl.when(tile < nt - 1)
        def _(): go(2)

    @pl.when(i == 0)                       # prime the pipeline (per image n)
    def _(): _issue(i, slot, True)
    _issue(i, slot, False)                 # wait on tile i's rows
    @pl.when(i + 1 < nt)                   # prefetch tile i+1 into other slot
    def _(): _issue(i + 1, 1 - slot, True)

    # ---- masked activation values (halo ring / out-of-image rows -> 0) -----
    rr2 = lax.broadcasted_iota(jnp.int32, (TRp2, Wp2), 0)
    cc2 = lax.broadcasted_iota(jnp.int32, (TRp2, Wp2), 1)
    keep_x = ((cc2 >= 1) & (cc2 <= W)
              & (i * TR - 1 + rr2 >= 0) & (i * TR - 1 + rr2 < h_valid))
    xm = jnp.where(keep_x[:, :, None], xbuf[slot], 0.0)      # (TRp2,Wp2,CX) bf16

    rr8 = lax.broadcasted_iota(jnp.int32, (TRp2, Wp8), 0)
    cc8 = lax.broadcasted_iota(jnp.int32, (TRp2, Wp8), 1)
    keep_l = ((cc8 >= 1) & (cc8 <= W)
              & (i * TR - 1 + rr8 >= 0) & (i * TR - 1 + rr8 < h_valid))

    # Fused conv1 (1x1, BN scale folded) + shift + ReLU on the low-level tile.
    # lbuf is width-padded to a multiple of 8 so this reshape is layout-free.
    lf = jnp.dot(lbuf[slot].reshape(TRp2 * Wp8, CL), w1_ref[...],
                 preferred_element_type=jnp.float32) + b1_ref[...]
    lf = jnp.maximum(lf, 0.0).reshape(TRp2, Wp8, C48)
    lf = jnp.where(keep_l[:, :, None], lf, 0.0).astype(jnp.bfloat16)

    # ---- kw-concatenated slab: [x@kw0|x@kw1|x@kw2|lf@kw0|lf@kw1|lf@kw2] ----
    for kw in range(3):
        slab[:, :, kw * CX:(kw + 1) * CX] = xm[:, kw:kw + W, :]
    for kw in range(3):
        slab[:, :, 3 * CX + kw * C48:3 * CX + (kw + 1) * C48] = lf[:, kw:kw + W, :]

    # ---- 3x3 conv as 3 MXU dots (one per kh) over the 912-deep contraction -
    acc = jnp.dot(slab[0:TR].reshape(TR * W, CC), w_ref[0],
                  preferred_element_type=jnp.float32)
    for kh in (1, 2):
        acc = acc + jnp.dot(slab[kh:kh + TR].reshape(TR * W, CC), w_ref[kh],
                            preferred_element_type=jnp.float32)

    y = jnp.maximum(acc + b0_ref[...], 0.0).reshape(TR, W, CM)
    if mask_tail:          # zero rows >= true H so K2's halo reads zeros
        orow = i * TR + lax.broadcasted_iota(jnp.int32, (TR, W), 0)
        y = jnp.where((orow < h_valid)[:, :, None], y, 0.0)
    # TODO(synk): Dropout(0.5) is an inference-mode identity.
    o_ref[...] = y.reshape(1, TR, W, CM).astype(o_ref.dtype)


def conv0_fused(xup, low, w_cat, w1f, b1, b0, TR, h_valid):
    N, Hp, W, CX = xup.shape
    CL = low.shape[3]
    C48 = w1f.shape[1]
    CC, CM = w_cat.shape[1], w_cat.shape[2]
    Wp8 = _round_up(W + 2, 8)
    kern = functools.partial(_k1_kernel, h_valid=h_valid, mask_tail=(Hp > h_valid))
    return pl.pallas_call(
        kern,
        out_shape=jax.ShapeDtypeStruct((N, Hp, W, CM), jnp.bfloat16),
        grid=(N, Hp // TR),
        in_specs=[
            pl.BlockSpec(memory_space=pl.ANY),                    # x_up (HBM)
            pl.BlockSpec(memory_space=pl.ANY),                    # low  (HBM)
            pl.BlockSpec((3, CC, CM), lambda n, i: (0, 0, 0)),
            pl.BlockSpec((CL, C48), lambda n, i: (0, 0)),
            pl.BlockSpec((1, C48), lambda n, i: (0, 0)),
            pl.BlockSpec((1, CM), lambda n, i: (0, 0)),
        ],
        out_specs=pl.BlockSpec((1, TR, W, CM), lambda n, i: (n, i, 0, 0)),
        scratch_shapes=[
            pltpu.VMEM((2, TR + 2, W + 2, CX), jnp.bfloat16),
            pltpu.VMEM((2, TR + 2, Wp8, CL), jnp.bfloat16),
            pltpu.VMEM((TR + 2, W, CC), jnp.bfloat16),
            pltpu.SemaphoreType.DMA((2, 2, 3)),
        ],
        compiler_params=pltpu.CompilerParams(
            dimension_semantics=("parallel", "arbitrary"),
            vmem_limit_bytes=_vmem_limit_bytes()),
    )(xup, low, w_cat, w1f, b1, b0)


# ---------------------------------------------------------------------------
# K2: fused 3x3 conv + BN + ReLU + final 1x1 conv (+bias), row-tiled,
#     double-buffered halo DMA, lane-dense output.
# ---------------------------------------------------------------------------
def _k2_kernel(h_hbm, w_ref, b_ref, w2_ref, b2_ref, o_ref, hbuf, slab, sem,
               *, h_valid):
    n = pl.program_id(0)
    i = pl.program_id(1)
    nt = pl.num_programs(1)

    TRp2, Wp2, C = hbuf.shape[1], hbuf.shape[2], hbuf.shape[3]
    TR, W = TRp2 - 2, Wp2 - 2
    CC = w_ref.shape[1]
    K = w2_ref.shape[1]
    slot = lax.rem(i, 2)

    def _copy(tile, dst_slot, kind):
        if kind == 0:
            src, rows, dst = tile * TR, TR, 1
        elif kind == 1:
            src, rows, dst = tile * TR - 1, 1, 0
        else:
            src, rows, dst = tile * TR + TR, 1, TR + 1
        return pltpu.make_async_copy(
            h_hbm.at[n, pl.ds(src, rows)],
            hbuf.at[dst_slot, pl.ds(dst, rows), pl.ds(1, W), :],
            sem.at[dst_slot, kind])

    def _issue(tile, dst_slot, start):
        def go(kind):
            c = _copy(tile, dst_slot, kind)
            c.start() if start else c.wait()
        go(0)
        @pl.when(tile > 0)
        def _(): go(1)
        @pl.when(tile < nt - 1)
        def _(): go(2)

    @pl.when(i == 0)
    def _(): _issue(i, slot, True)
    _issue(i, slot, False)
    @pl.when(i + 1 < nt)
    def _(): _issue(i + 1, 1 - slot, True)

    rr = lax.broadcasted_iota(jnp.int32, (TRp2, Wp2), 0)
    cc = lax.broadcasted_iota(jnp.int32, (TRp2, Wp2), 1)
    keep = ((cc >= 1) & (cc <= W)
            & (i * TR - 1 + rr >= 0) & (i * TR - 1 + rr < h_valid))
    hm = jnp.where(keep[:, :, None], hbuf[slot], 0.0)        # (TRp2,Wp2,C) bf16

    for kw in range(3):
        slab[:, :, kw * C:(kw + 1) * C] = hm[:, kw:kw + W, :]

    acc = jnp.dot(slab[0:TR].reshape(TR * W, CC), w_ref[0],
                  preferred_element_type=jnp.float32)
    for kh in (1, 2):
        acc = acc + jnp.dot(slab[kh:kh + TR].reshape(TR * W, CC), w_ref[kh],
                            preferred_element_type=jnp.float32)
    y = jnp.maximum(acc + b_ref[...], 0.0)
    # TODO(synk): Dropout(0.1) is an inference-mode identity.
    out = jnp.dot(y.astype(jnp.bfloat16), w2_ref[...],
                  preferred_element_type=jnp.float32) + b2_ref[...]
    # Lane-dense store: (TR*W, K) -> (1, TR, W*K) so the output uses full-width
    # vector stores instead of K/128 masked lanes.
    o_ref[...] = out.reshape(1, TR, W * K).astype(o_ref.dtype)


def conv1_fused(h1, w_cat, b, w2, b2, TR, h_valid):
    N, Hp, W, C = h1.shape
    CC = w_cat.shape[1]
    K = w2.shape[1]
    kern = functools.partial(_k2_kernel, h_valid=h_valid)
    return pl.pallas_call(
        kern,
        out_shape=jax.ShapeDtypeStruct((N, Hp, W * K), jnp.float32),
        grid=(N, Hp // TR),
        in_specs=[
            pl.BlockSpec(memory_space=pl.ANY),                    # h1 (HBM)
            pl.BlockSpec((3, CC, C), lambda n, i: (0, 0, 0)),
            pl.BlockSpec((1, C), lambda n, i: (0, 0)),
            pl.BlockSpec((C, K), lambda n, i: (0, 0)),
            pl.BlockSpec((1, K), lambda n, i: (0, 0)),
        ],
        out_specs=pl.BlockSpec((1, TR, W * K), lambda n, i: (n, i, 0)),
        scratch_shapes=[
            pltpu.VMEM((2, TR + 2, W + 2, C), jnp.bfloat16),
            pltpu.VMEM((TR + 2, W, CC), jnp.bfloat16),
            pltpu.SemaphoreType.DMA((2, 3)),
        ],
        compiler_params=pltpu.CompilerParams(
            dimension_semantics=("parallel", "arbitrary"),
            vmem_limit_bytes=_vmem_limit_bytes()),
    )(h1, w_cat, b, w2, b2)


# ---------------------------------------------------------------------------
# Decoder forward
# ---------------------------------------------------------------------------
def decoder_forward(x_nchw, low_nchw, params, *, max_tile_rows=None):
    x = jnp.transpose(x_nchw, (0, 2, 3, 1)).astype(jnp.bfloat16)      # (N,Hi,Wi,Cx)
    low = jnp.transpose(low_nchw, (0, 2, 3, 1)).astype(jnp.bfloat16)  # (N,H,W,Cl)
    N, H, W, Cl = low.shape
    Cx = x.shape[3]
    C48 = params["conv1_w"].shape[0]
    CM = params["last0_w"].shape[0]
    K = params["last2_w"].shape[0]

    # Row tiling (multiple of 8); H is padded up so every tile is full-size.
    TR = _pick_tile_rows(H, W, Cx, Cl, C48, CM, max_tile_rows)
    Hp = _round_up(H, TR)

    # conv1 (1x1, no bias) with bn1 scale folded; shift becomes the bias.
    w1 = jnp.transpose(params["conv1_w"][:, :, 0, 0], (1, 0))          # (Cl, 48)
    w1f = (w1 * params["bn1_scale"][None, :]).astype(jnp.bfloat16)
    b1 = params["bn1_shift"].reshape(1, -1).astype(jnp.float32)

    # lastConv[0]: 3x3 conv (Cx+48 -> 256), BN scale folded, kw-concatenated so
    # [x@kw0|x@kw1|x@kw2|lf@kw0|lf@kw1|lf@kw2] matches the in-kernel slab.
    wt0 = jnp.transpose(params["last0_w"], (2, 3, 1, 0)) * params["bn_l0_scale"]
    w_cat0 = jnp.concatenate(
        [wt0[:, :, :Cx, :].reshape(3, 3 * Cx, CM),
         wt0[:, :, Cx:, :].reshape(3, 3 * C48, CM)], axis=1).astype(jnp.bfloat16)
    b0 = params["bn_l0_shift"].reshape(1, -1).astype(jnp.float32)

    # lastConv[4]: 3x3 conv (256 -> 256), BN scale folded, kw-concatenated.
    wt1 = jnp.transpose(params["last1_w"], (2, 3, 1, 0)) * params["bn_l1_scale"]
    w_cat1 = wt1.reshape(3, 3 * CM, CM).astype(jnp.bfloat16)
    bL1 = params["bn_l1_shift"].reshape(1, -1).astype(jnp.float32)

    # lastConv[8]: final 1x1 conv with bias.
    w2 = jnp.transpose(params["last2_w"][:, :, 0, 0], (1, 0)).astype(jnp.bfloat16)
    b2 = params["last2_b"].reshape(1, -1).astype(jnp.float32)

    # Bilinear matrices (align_corners=True); the height matrix is zero-extended
    # to Hp rows so upsampled rows >= H are exactly zero.
    Ah = _bilinear_matrix(H, x.shape[1])
    if Hp > H:
        Ah = np.pad(Ah, ((0, Hp - H), (0, 0)))
    Aw = _bilinear_matrix(W, x.shape[2])
    Ah = jnp.asarray(Ah, jnp.bfloat16)
    Aw = jnp.asarray(Aw, jnp.bfloat16)

    # Low-level features: pad rows only when H is ragged (tiny tensor); the
    # width/row halo is otherwise assembled in-kernel (no HBM pad passes).
    if Hp > H:
        low = jnp.pad(low, ((0, 0), (0, Hp - H), (0, 0), (0, 0)))

    xup = bilinear_resize(x, Ah, Aw, TR)                     # (N,Hp,W,Cx) bf16
    h1 = conv0_fused(xup, low, w_cat0, w1f, b1, b0, TR, H)   # (N,Hp,W,CM) bf16
    out = conv1_fused(h1, w_cat1, bL1, w2, b2, TR, H)        # (N,Hp,W*K) f32
    out = out[:, :H, :].reshape(N, H, W, K)
    return jnp.transpose(out, (0, 3, 1, 2))                  # NCHW


# ---------------------------------------------------------------------------
# Deterministic parameter init (mimics kaiming_normal_ + default BN stats)
# ---------------------------------------------------------------------------
def _kaiming_normal(key, cout, cin, kh, kw):
    fan_in = cin * kh * kw
    std = float(np.sqrt(2.0 / fan_in))
    return std * jax.random.normal(key, (cout, cin, kh, kw), jnp.float32)


def _bn_fold(c, eps=1e-5):
    gamma = jnp.ones((c,), jnp.float32)
    beta = jnp.zeros((c,), jnp.float32)
    mean = jnp.zeros((c,), jnp.float32)
    var = jnp.ones((c,), jnp.float32)
    scale = gamma / jnp.sqrt(var + eps)
    shift = beta - mean * scale
    return scale, shift


if __name__ == "__main__":
    num_classes = 8
    lowlevel_channels = 24        # 'mobilenet' backbone branch

    key = jax.random.PRNGKey(0)
    ks = jax.random.split(key, 7)

    bn1_s, bn1_b = _bn_fold(48)
    bn0_s, bn0_b = _bn_fold(256)
    bnl1_s, bnl1_b = _bn_fold(256)

    params = {
        "conv1_w": _kaiming_normal(ks[0], 48, lowlevel_channels, 1, 1),
        "bn1_scale": bn1_s, "bn1_shift": bn1_b,
        "last0_w": _kaiming_normal(ks[1], 256, 304, 3, 3),
        "bn_l0_scale": bn0_s, "bn_l0_shift": bn0_b,
        "last1_w": _kaiming_normal(ks[2], 256, 256, 3, 3),
        "bn_l1_scale": bnl1_s, "bn_l1_shift": bnl1_b,
        "last2_w": _kaiming_normal(ks[3], num_classes, 256, 1, 1),
        "last2_b": jax.random.uniform(ks[4], (num_classes,), jnp.float32,
                                      -1.0 / np.sqrt(256.0), 1.0 / np.sqrt(256.0)),
    }

    # x = ASPP output (256 channels, coarse), lowlevelFeat = backbone feature.
    x = jax.random.normal(ks[5], (2, 256, 8, 8), jnp.float32)
    lowlevel = jax.random.normal(ks[6], (2, lowlevel_channels, 16, 16), jnp.float32)

    # max_tile_rows=8 forces 2 row tiles per image so the halo-assembly and
    # double-buffered prefetch paths are exercised.
    out = decoder_forward(x, lowlevel, params, max_tile_rows=8)
    out = jax.block_until_ready(out)
    assert out.shape == (2, num_classes, 16, 16), out.shape
    assert bool(jnp.all(jnp.isfinite(out)))
    print("KERNEL_OK")
</pallas_src>

<mosaic_0001>
module attributes {stable_mosaic.version = 11 : i64} {
  func.func @_resize_kernel(%arg0: i32, %arg1: i32, %arg2: memref<8x8xbf16, #tpu.memory_space<vmem>>, %arg3: memref<16x8xbf16, #tpu.memory_space<vmem>>, %arg4: memref<1x8x2048xbf16, #tpu.memory_space<vmem>>, %arg5: memref<1x8x16x256xbf16, #tpu.memory_space<vmem>>) attributes {dimension_semantics = [#tpu.dimension_semantics<parallel>, #tpu.dimension_semantics<arbitrary>], iteration_bounds = array<i64: 2, 2>, scalar_prefetch = 0 : i64, scratch_operands = 0 : i64, tpu.core_type = #tpu.core_type<tc>, window_params = [{transform_indices = @transform_0, window_bounds = array<i64: 8, 8>}, {pipeline_mode = #tpu.pipeline_mode<synchronous>, transform_indices = @transform_1, window_bounds = array<i64: 16, 8>}, {transform_indices = @transform_2, window_bounds = array<i64: 1, 8, 2048>}, {transform_indices = @transform_3, window_bounds = array<i64: 1, 8, 16, 256>}]} {
    %c0 = arith.constant 0 : index
    %c0_0 = arith.constant 0 : index
    %0 = vector.load %arg2[%c0, %c0_0] : memref<8x8xbf16, #tpu.memory_space<vmem>>, vector<8x8xbf16>
    %c0_1 = arith.constant 0 : index
    %c0_2 = arith.constant 0 : index
    %c0_3 = arith.constant 0 : index
    %1 = vector.load %arg4[%c0_1, %c0_2, %c0_3] : memref<1x8x2048xbf16, #tpu.memory_space<vmem>>, vector<1x8x2048xbf16>
    %2 = vector.shape_cast %1 : vector<1x8x2048xbf16> to vector<8x2048xbf16>
    %cst = arith.constant dense<0.000000e+00> : vector<8x2048xf32>
    %3 = tpu.matmul %0, %2, %cst {dimension_numbers = #tpu.dot_dimension_numbers<[1], [0], [0], [1], [0, 0, 1, 1], [], []>} : vector<8x8xbf16>, vector<8x2048xbf16>, vector<8x2048xf32> -> vector<8x2048xf32>
    %4 = arith.truncf %3 : vector<8x2048xf32> to vector<8x2048xbf16>
    %5 = vector.shape_cast %4 : vector<8x2048xbf16> to vector<8x8x256xbf16>
    %c0_4 = arith.constant 0 : index
    %c0_5 = arith.constant 0 : index
    %6 = vector.load %arg3[%c0_4, %c0_5] : memref<16x8xbf16, #tpu.memory_space<vmem>>, vector<16x8xbf16>
    %7 = vector.shape_cast %6 : vector<16x8xbf16> to vector<1x16x8xbf16>
    %8 = vector.broadcast %7 : vector<1x16x8xbf16> to vector<8x16x8xbf16>
    %cst_6 = arith.constant dense<0.000000e+00> : vector<8x16x256xf32>
    %9 = tpu.matmul %8, %5, %cst_6 {dimension_numbers = #tpu.dot_dimension_numbers<[2], [1], [1], [2], [0, 0, 0, 1, 1, 2], [0], [0]>} : vector<8x16x8xbf16>, vector<8x8x256xbf16>, vector<8x16x256xf32> -> vector<8x16x256xf32>
    %10 = arith.truncf %9 : vector<8x16x256xf32> to vector<8x16x256xbf16>
    %c0_7 = arith.constant 0 : index
    %c0_8 = arith.constant 0 : index
    %c0_9 = arith.constant 0 : index
    %c0_10 = arith.constant 0 : index
    %11 = vector.load %arg5[%c0_7, %c0_8, %c0_9, %c0_10] : memref<1x8x16x256xbf16, #tpu.memory_space<vmem>>, vector<1x8x16x256xbf16>
    %12 = vector.shape_cast %11 : vector<1x8x16x256xbf16> to vector<8x16x256xbf16>
    %13 = vector.shape_cast %10 : vector<8x16x256xbf16> to vector<1x8x16x256xbf16>
    tpu.vector_store %arg5[%c0_7, %c0_8, %c0_9, %c0_10], %13 {strides = array<i32>} : memref<1x8x16x256xbf16, #tpu.memory_space<vmem>>, vector<1x8x16x256xbf16>,
    return
  }
  func.func @transform_0(%arg0: i32, %arg1: i32) -> (i32, i32) {
    %c0_i32 = arith.constant 0 : i32
    %c0_i32_0 = arith.constant 0 : i32
    return %arg1, %c0_i32 : i32, i32
  }
  func.func @transform_1(%arg0: i32, %arg1: i32) -> (i32, i32) {
    %c0_i32 = arith.constant 0 : i32
    %c0_i32_0 = arith.constant 0 : i32
    %c0_i32_1 = arith.constant 0 : i32
    return %c0_i32, %c0_i32_0 : i32, i32
  }
  func.func @transform_2(%arg0: i32, %arg1: i32) -> (i32, i32, i32) {
    %c0_i32 = arith.constant 0 : i32
    %c0_i32_0 = arith.constant 0 : i32
    %c0_i32_1 = arith.constant 0 : i32
    return %arg0, %c0_i32, %c0_i32_0 : i32, i32, i32
  }
  func.func @transform_3(%arg0: i32, %arg1: i32) -> (i32, i32, i32, i32) {
    %c0_i32 = arith.constant 0 : i32
    %c0_i32_0 = arith.constant 0 : i32
    %c0_i32_1 = arith.constant 0 : i32
    return %arg0, %arg1, %c0_i32, %c0_i32_0 : i32, i32, i32, i32
  }
}

</mosaic_0001>

<bundles_post_ra>
// kernel: tpu_custom_call.1
= control target key start
LH: loop header
LB: loop body
LE: loop exit
PB: predicated region body
PF: predicated region fallthrough
CT: control target
= control target key end

     0   :  { %8 = vsyncpa [#allocation3], 0  ;;  %s2308_s0 = inlined_call_operand.vmem [shape: bf16[16,8], index: 0, kind: input, shape index: {}]   ;;  %s2309_s1 = inlined_call_operand.vmem [shape: bf16[16,8], index: 1, kind: input, shape index: {}]   ;;  %s2310_s2 = inlined_call_operand.hbm [shape: bf16[2,8,2048], index: 2, kind: input, shape index: {}]   ;;  %s2311_s3 = inlined_call_operand.hbm [shape: bf16[2,16,16,256], index: 3, kind: output, shape index: {}]  }
   0x1   :  { %10 = vsyncpa [#allocation3 + $0x1], 0 }
   0x2   :  { %11 = vsyncpa [#allocation4], 0 }
   0x3   :  { %13 = vsyncpa [#allocation4 + $0x1], 0  ;;  %s1982_s12 = smov 0   ;;  %s1984_s13 = smov 0  }
   0x4   :  { %s1986_s14 = smov 0   ;;  %s1988_s15 = smov 0  }
   0x5   :  { %s1990_s16 = smov 0   ;;  %s1992_s17 = smov 0  }
   0x6   :  { %s1994_s18 = smov 0   ;;  %s1996_s19 = smov 0  }
   0x7   :  { %s1998_s20 = smov 0   ;;  %s2000_s21 = smov 0  }
   0x8   :  { %s2002_s22 = smov 0  }
   0x9 LB: > { %s1536_s23 = sadd.s32 4294967295, %s1953_s22   ;;  %s1537_s24 = sadd.s32 4294967294, %s1953_s22   ;;  %s1953_s22 = sphi %s2002_s22, %s19_s22   ;;  %s1949_s21 = sphi %s2000_s21, %s2334_s21   ;;  %s1945_s20 = sphi %s1998_s20, %s2333_s20   ;;  %s1941_s19 = sphi %s1996_s19, %s2332_s19   ;;  %s1937_s18 = sphi %s1994_s18, %s2331_s18   ;;  %s1933_s17 = sphi %s1992_s17, %s2330_s17   ;;  %s1929_s16 = sphi %s1990_s16, %s2329_s16   ;;  %s1925_s15 = sphi %s1988_s15, %s2328_s15   ;;  %s1921_s14 = sphi %s1986_s14, %s2327_s14   ;;  %s1917_s13 = sphi %s1984_s13, %s2326_s13   ;;  %s1913_s12 = sphi %s1982_s12, %s2325_s12  }
   0xa   : > { %s28_s25 = sadd.s32 1, %s1945_s20  ;;  %s31_s26 = sadd.s32 1, %s1949_s21 }
   0xb   : > { %p29_p0 = scmp.ge.s32.totalorder %s28_s25, 2  ;;  %s85_s27 = sadd.s32 1, %s1933_s17 }
   0xc   : > { %p92_p1 = scmp.ne.s32.totalorder %s1933_s17, %s1929_s16  ;;  %p93_p2 = scmp.eq.s32.totalorder %s1953_s22, 0 }
   0xd   : > { %s2336_s25 = smov (%p29_p0, %s28_s25), 0  ;;  %s2338_s26 = smov (!%p29_p0, %s31_s26), %s1949_s21 }
   0xe   : > { %p2046_p3 = por %p93_p2, %p92_p1  ;;  %p98_p4 = scmp.ne.s32.totalorder %s1929_s16, %s1925_s15 }
   0xf   : > { %p33_p5 = scmp.ge.s32.totalorder %s2338_s26, 2  ;;  %p99_p6 = scmp.eq.s32.totalorder %s1536_s23, 0 }
  0x10   : > { %s109_s29 = ssub.s32 %s1945_s20, %s2336_s25  ;;  %s113_s30 = sadd.s32 1, %s1921_s14 }
  0x11   : > { %s2340_s26 = smov (%p33_p5, %s2338_s26), 0  ;;  %p2056_p7 = por %p99_p6, %p98_p4 }
  0x12   : > { %2315 = sst [smem:[#allocation8_spill]] %s2340_s26  ;;  %p123_p8 = scmp.ne.s32.totalorder %s1921_s14, %s1917_s13 }
  0x13   : > { %s82_s5 = ssub.s32 %s1949_s21, %s2340_s26  ;;  %p124_p9 = scmp.eq.s32.totalorder %s1536_s23, 3 }
  0x14   : > { %p83_p10 = scmp.eq.s32.totalorder %s82_s5, 0  ;;  %s110_s6 = sor.u32 %s109_s29, %s82_s5 }
  0x15   : > { %p111_p11 = scmp.eq.s32.totalorder %s110_s6, 0  ;;  %p2064_p12 = por %p124_p9, %p123_p8 }
  0x16   : > { %s2069_s8 = scalar_select %p83_p10, %s1933_s17, %s85_s27  }
  0x17   : > { %s2317_s7 = scalar_select %p2064_p12, 1, 0 }
  0x18   : > { %s2072_s9 = scalar_select %p111_p11, %s1921_s14, %s113_s30  }
  0x19   : > { %p129_p13 = scmp.ne.s32.totalorder %s1917_s13, %s1913_s12  ;;  %p130_p0 = scmp.eq.s32.totalorder %s1537_s24, 3 }
  0x1a   : > { %p1689_p1 = scmp.lt.s32.totalorder %s1953_s22, 4  ;;  %s160_s11 = sand.u32 1, %s1933_s17  }
  0x1b   : > { %p2077_p2 = por %p130_p0, %p129_p13  ;;  %s1540_s15 = sshll.u32 %s160_s11, 6 }
  0x1c   : > { %s1651_s23 = sshll.u32 %s1949_s21, 10  ;;  %s164_s27 = scalar_lea.vmem [#allocation2], %s1540_s15 }
  0x1d   : > { %s2318_s10 = scalar_select %p2077_p2, 1, 0 }
  0x1e   : > { %s2086_s6 = scalar_lea.hbm %s2310_s2, %s1651_s23  ;;  %s172_s30 = sshll.u32 %s164_s27, 4  ;;  %s2088_s30 = int_to_ptr.vmem [resolvable:$true] %s172_s30 }
  0x1f   : > { %p2092_p4 = pnand %p1689_p1, %p2046_p3  ;;  %s161_s29 = scalar_lea.sflag [#allocation3], %s160_s11 }
  0x20   : > { %s1801_s23 = scalar_lea.hbm %s2086_s6, 1024  ;;  %s1806_s28 = scalar_lea.hbm %s2310_s2, 2048 }
  0x21   : > { %p1802_p8 = scmp.ne.s32.totalorder %s2086_s6, %s1801_s23  ;;  %p1803_p9 = pneg %p2092_p4 }
  0x22   : > { %p1807_p3 = scmp.lt.u32.totalorder %s2086_s6, %s2310_s2  ;;  %p1808_p13 = scmp.lt.u32.totalorder %s1806_s28, %s1801_s23 }
  0x23   : > { %p1804_p10 = pnand %p1803_p9, %p1802_p8  ;;  %p1810_p1 = scmp.lt.u32.totalorder %s1801_s23, %s2086_s6 }
  0x24   : > { %p1809_p0 = por %p1808_p13, %p1807_p3 }
  0x25   : > { %p1805_p11 = pneg %p1804_p10 }
  0x26   : > { %p1811_p5 = por %p1810_p1, %p1809_p0 }
  0x28   : > { %p1812_p6 = pnand %p1811_p5, %p1805_p11 }
  0x2a   : > { %1815 = shalt.err (!%p1812_p6)
}
  0x2b   : > { %s1816_s11 = scalar_lea.vmem %s2088_s30, 1024  ;;  %s1955_s15 = smov [#allocation2]  }
  0x2c   : > { %p1817_p8 = scmp.ne.s32.totalorder %s2088_s30, %s1816_s11  ;;  %s1821_s5 = sshll.u32 %s1955_s15, 4  ;;  %s1822_s5 = int_to_ptr.vmem [resolvable:$false] %s1821_s5 }
  0x2d   : > { %s1823_s26 = scalar_lea.vmem %s1822_s5, 2048  ;;  %p1824_p12 = scmp.lt.s32.totalorder %s2088_s30, %s1822_s5 }
  0x2e   : > { %p1819_p10 = pnand %p1817_p8, %p1803_p9  ;;  %p1825_p3 = scmp.lt.s32.totalorder %s1823_s26, %s1816_s11 }
  0x30   : > { %p1820_p2 = pneg %p1819_p10  ;;  %p1826_p13 = por %p1825_p3, %p1824_p12 }
  0x32   : > { %p1827_p0 = pnand %p1826_p13, %p1820_p2 }
  0x34   : > { %1830 = shalt.err (!%p1827_p0)
}
  0x35   : > { %1684 = dma.hbm_to_vmem [thread:$0]  (!%p2092_p4), %s2086_s6, 1024, %s2088_s30, %s161_s29  }
  0x36   : > { %p2320_p5 = scmp.lt.s32.totalorder %s1953_s22, 5  ;;  %p2321_p6 = scmp.ge.s32.totalorder %s1953_s22, 1 }
  0x38   : > { %p178_p9 = pnand %p2321_p6, %p2320_p5 }
  0x39   : > { %s183_s23 = sand.u32 (!%p178_p9), 1, %s1929_s16  }
  0x3a   : > { %181 = sbr.rel (%p178_p9) target bundleno = 587 (0x24b), region = 32  ;;  %s1544_s28 = sshll.u32 (!%p178_p9), %s183_s23, 6 }
  0x3b   : > { %s184_s27 = scalar_lea.sflag (!%p178_p9), [#allocation3], %s183_s23  ;;  %s2128_s11 = scalar_lea.vmem (!%p178_p9), [#allocation2], %s1544_s28 }
  0x41   : > { %1904 = dma.done.wait (%p2056_p7), %s184_s27, 1024  }
  0x42   : > { %1906 = vsyncadd (%p2056_p7), %s184_s27, 4294966272  ;;  %p214_p12 = scmp.lt.s32.totalorder %s1937_s18, 1  ;;  %v1956_v0 = vmov 0   ;;  %v221_v1 = vld [vmem:[%s2128_s11] sm:$0xff]  ;;  %vm273_vm0 = vcmask 1043456   ;;  %v222_v2 = vld [vmem:[%s2128_s11 + $0x8] sm:$0xff]  ;;  %v719_v52 = vlaneseq }
  0x43   : > { %354 = vmatprep.mubr.bf16.mxu0 %v1956_v0  ;;  %395 = vmatprep.mubr.bf16.mxu1 %v1956_v0  ;;  %v1548_v3 = vcombine.high %v221_v1, %v221_v1  ;;  %v1550_v4 = vcombine.high %v222_v2, %v222_v2  ;;  %v1547_v5 = vcombine.low %v221_v1, %v221_v1  ;;  %v223_v7 = vld [vmem:[%s2128_s11 + $0x10] sm:$0xff]  ;;  %v224_v8 = vld [vmem:[%s2128_s11 + $0x18] sm:$0xff]  ;;  %v225_v13 = vld [vmem:[%s2128_s11 + $0x20] sm:$0xff]  ;;  %vm269_vm1 = vcmask 64512   ;;  %s211_s26 = sand.u32 1, %s1917_s13   ;;  %s1676_s27 = sshll.u32 %s1937_s18, 5 }
  0x44   : > { %s215_s6 = scalar_select %p214_p12, %s1937_s18, 1  ;;  %v1549_v6 = vcombine.low %v222_v2, %v222_v2  ;;  %v1552_v9 = vcombine.high %v223_v7, %v223_v7  ;;  %v1554_v10 = vcombine.high %v224_v8, %v224_v8  ;;  %v1551_v11 = vcombine.low %v223_v7, %v223_v7  ;;  %v226_v14 = vld [vmem:[%s2128_s11 + $0x28] sm:$0xff]  ;;  %v227_v24 = vld [vmem:[%s2128_s11 + $0x30] sm:$0xff]  ;;  %v228_v25 = vld [vmem:[%s2128_s11 + $0x38] sm:$0xff] }
  0x45   : > { %v1553_v12 = vcombine.low %v224_v8, %v224_v8  ;;  %1563 = vmatprep.subr.msk.bf16.mxu0 %vm273_vm0, %v1548_v3  ;;  %1565 = vmatprep.subr.msk.bf16.mxu1 %vm273_vm0, %v1550_v4  ;;  %v275_v15 = vsel %vm273_vm0, %v1547_v5, 0  ;;  %v1556_v20 = vcombine.high %v225_v13, %v225_v13  ;;  %v1558_v21 = vcombine.high %v226_v14, %v226_v14  ;;  %s1545_s23 = sshll.u32 %s211_s26, 7  ;;  %s1647_s11 = sshll.u32 %s1941_s19, 6 }
  0x46   : > { %s1546_s30 = sshll.u32 %s215_s6, 2  ;;  %v281_v16 = vsel %vm273_vm0, %v1549_v6, 0  ;;  %323 = vmatpush1.bf16.msra.mxu0 %v275_v15  ;;  %v287_v18 = vsel %vm273_vm0, %v1551_v11, 0  ;;  %v1555_v22 = vcombine.low %v225_v13, %v225_v13  ;;  %v1557_v23 = vcombine.low %v226_v14, %v226_v14  ;;  %s2217_s28 = scalar_lea.vmem [#allocation5], %s1545_s23 }
  0x47   : > { %s217_s29 = scalar_lea.vmem %s2308_s0, %s1546_s30  ;;  %364 = vmatpush1.bf16.msra.mxu1 %v281_v16  ;;  %1567 = vmatprep.subr.msk.bf16.mxu0 %vm273_vm0, %v1552_v9  ;;  %v293_v19 = vsel %vm273_vm0, %v1553_v12, 0  ;;  %v1560_v28 = vcombine.high %v227_v24, %v227_v24  ;;  %v1562_v29 = vcombine.high %v228_v25, %v228_v25  ;;  %v1559_v30 = vcombine.low %v227_v24, %v227_v24  ;;  %s1434_s6 = sadd.s32 %s1676_s27, %s1647_s11 }
  0x48   : > { %v220_v17 = vld [vmem:[%s217_s29] sm:$0xf]  ;;  %1569 = vmatprep.subr.msk.bf16.mxu1 %vm273_vm0, %v1554_v10  ;;  %v299_v26 = vsel %vm273_vm0, %v1555_v22, 0  ;;  %v305_v27 = vsel %vm273_vm0, %v1557_v23, 0  ;;  %v1561_v31 = vcombine.low %v228_v25, %v228_v25  ;;  %v1957_v50 = vmov 1983009808  }
  0x49   : > { %1564 = vmatmul.mubr.msk.bf16.vlgmr.msra.gmra.mrb[0].mxu0 %vm269_vm1, %v220_v17  ;;  %v311_v32 = vsel %vm273_vm0, %v1559_v30, 0  ;;  %v717_v51 = vunpack.c.l.s4 %v1957_v50  ;;  %v1958_v63 = vmov 1934713408   ;;  %v720_v3 = vshrl.u32 %v719_v52, 7  ;;  %s1648_s30 = sshll.u32 %s1434_s6, 6  ;;  %s1437_s4 = sshll.u32 %s2217_s28, 4  ;;  %s2240_s4 = int_to_ptr.vmem [resolvable:$true] %s1437_s4 }
  0x4a   : > { %1566 = vmatmul.mubr.msk.bf16.vlgmr.msra.gmra.mrb[0].mxu1 %vm269_vm1, %v220_v17  ;;  %405 = vmatpush1.bf16.msra.mxu0 %v287_v18  ;;  %v317_v33 = vsel %vm273_vm0, %v1561_v31, 0  ;;  %v749_v1 = vunpack.c.l.s4 %v1958_v63  ;;  %s2238_s24 = scalar_lea.hbm %s2311_s3, %s1648_s30  ;;  %s2247_s29 = scalar_lea.sflag [#allocation4], %s211_s26 }
  0x4b   : > { %446 = vmatpush1.bf16.msra.mxu1 %v293_v19  ;;  %436 = vmatprep.mubr.bf16.mxu0 %v1956_v0  ;;  %v718_v2 = vunpack.c.0.s8 %v717_v51  ;;  %s1831_s15 = scalar_lea.vmem %s2240_s4, 2048  ;;  %p2322_p2 = scmp.ne.s32.totalorder %s2317_s7, 0 }
  0x4c   : > { %477 = vmatprep.mubr.bf16.mxu1 %v1956_v0  ;;  %1571 = vmatprep.subr.msk.bf16.mxu0 %vm273_vm0, %v1556_v20  ;;  %v750_v6 = vunpack.c.0.s8 %v749_v1  ;;  %p1832_p7 = scmp.ne.s32.totalorder %s2240_s4, %s1831_s15  ;;  %s1959_s5 = smov [#allocation5]  }
  0x4d   : > { %1573 = vmatprep.subr.msk.bf16.mxu1 %vm273_vm0, %v1558_v21  ;;  %v721_v7 = vsub.s32 %v718_v2, %v720_v3  ;;  %s1835_s23 = sshll.u32 %s1959_s5, 4  ;;  %s1836_s23 = int_to_ptr.vmem [resolvable:$false] %s1835_s23 }
  0x4e   : > { %v753_v14 = vsub.s32 %v750_v6, %v720_v3  ;;  %p1833_p4 = pnand %p1832_p7, %p2322_p2  ;;  %s1837_s27 = scalar_lea.vmem %s1836_s23, 4096 }
  0x4f   : > { %p1838_p1 = scmp.lt.s32.totalorder %s2240_s4, %s1836_s23  ;;  %p1839_p8 = scmp.lt.s32.totalorder %s1837_s27, %s1831_s15 }
  0x50   : > { %p1834_p11 = pneg %p1833_p4 }
  0x51   : > { %1568 = vmatmul.mubr.msk.bf16.vlgmr.msra.gmra.mrb[4].mxu0 %vm269_vm1, %v220_v17  ;;  %p1840_p10 = por %p1839_p8, %p1838_p1 }
  0x52   : > { %1570 = vmatmul.mubr.msk.bf16.vlgmr.msra.gmra.mrb[4].mxu1 %vm269_vm1, %v220_v17  ;;  %487 = vmatpush1.bf16.msra.mxu0 %v299_v26 }
  0x53   : > { %528 = vmatpush1.bf16.msra.mxu1 %v305_v27  ;;  %518 = vmatprep.mubr.bf16.mxu0 %v1956_v0  ;;  %p1841_p3 = pnand %p1840_p10, %p1834_p11 }
  0x54   : > { %559 = vmatprep.mubr.bf16.mxu1 %v1956_v0  ;;  %1575 = vmatprep.subr.msk.bf16.mxu0 %vm273_vm0, %v1560_v28 }
  0x55   : > { %1577 = vmatprep.subr.msk.bf16.mxu1 %vm273_vm0, %v1562_v29 }
  0x59   : > { %1572 = vmatmul.mubr.msk.bf16.vlgmr.msra.gmra.mrb[8].mxu0 %vm269_vm1, %v220_v17 }
  0x5a   : > { %1574 = vmatmul.mubr.msk.bf16.vlgmr.msra.gmra.mrb[8].mxu1 %vm269_vm1, %v220_v17  ;;  %569 = vmatpush1.bf16.msra.mxu0 %v311_v32 }
  0x5b   : > { %610 = vmatpush1.bf16.msra.mxu1 %v317_v33  ;;  %600 = vmatprep.mubr.bf16.mxu0 %v1956_v0 }
  0x5c   : > { %641 = vmatprep.mubr.bf16.mxu1 %v1956_v0 }
  0x61   : > { %1576 = vmatmul.mubr.msk.bf16.vlgmr.msra.gmra.mrb[12].mxu0 %vm269_vm1, %v220_v17 }
  0x62   : > { %1578 = vmatmul.mubr.msk.bf16.vlgmr.msra.gmra.mrb[12].mxu1 %vm269_vm1, %v220_v17  ;;  %926 = vmatprep.mubr.bf16.mxu0 %v1956_v0 }
  0x63   : > { %979 = vmatprep.mubr.bf16.mxu1 %v1956_v0 }
 0x11c   : > { %v356_v34 = vpop.f32.mrb[0].mxu0 }
 0x11d   : > { %v397_v35 = vpop.f32.mrb[0].mxu1  ;;  %v358_v36 = vpop.f32.mrb[1].mxu0 }
 0x11e   : > { %v399_v37 = vpop.f32.mrb[1].mxu1  ;;  %v360_v38 = vpop.f32.mrb[2].mxu0 }
 0x11f   : > { %v401_v39 = vpop.f32.mrb[2].mxu1  ;;  %v361_v40 = vpop.f32.mrb[3].mxu0 }
 0x120   : > { %v402_v41 = vpop.f32.mrb[3].mxu1 }
 0x124   : > { %v438_v42 = vpop.f32.mrb[4].mxu0 }
 0x125   : > { %v479_v43 = vpop.f32.mrb[4].mxu1  ;;  %v440_v44 = vpop.f32.mrb[5].mxu0 }
 0x126   : > { %v481_v45 = vpop.f32.mrb[5].mxu1  ;;  %v442_v46 = vpop.f32.mrb[6].mxu0 }
 0x127   : > { %v483_v47 = vpop.f32.mrb[6].mxu1  ;;  %v443_v48 = vpop.f32.mrb[7].mxu0 }
 0x128   : > { %v484_v49 = vpop.f32.mrb[7].mxu1 }
 0x12c   : > { %v520_v53 = vpop.f32.mrb[8].mxu0 }
 0x12d   : > { %v561_v54 = vpop.f32.mrb[8].mxu1  ;;  %v1587_v55 = vpack.c.bf16 %v520_v53, %v356_v34  ;;  %v522_v57 = vpop.f32.mrb[9].mxu0 }
 0x12e   : > { %v1591_v56 = vpack.c.bf16 %v561_v54, %v397_v35  ;;  %v563_v58 = vpop.f32.mrb[9].mxu1  ;;  %v1588_v59 = vpack.c.bf16 %v522_v57, %v358_v36  ;;  %v524_v61 = vpop.f32.mrb[10].mxu0 }
 0x12f   : > { %v1592_v60 = vpack.c.bf16 %v563_v58, %v399_v37  ;;  %v565_v62 = vpop.f32.mrb[10].mxu1  ;;  %v525_v4 = vpop.f32.mrb[11].mxu0  ;;  %v722_v19 = vrot.slane %v1587_v55, %v721_v7 }
 0x130   : > { %v566_v5 = vpop.f32.mrb[11].mxu1  ;;  %v790_v20 = vrot.slane %v1591_v56, %v721_v7  ;;  %v729_v25 = vrot.slane %v1588_v59, %v721_v7 }
 0x131   : > { %v797_v26 = vrot.slane %v1592_v60, %v721_v7 }
 0x134   : > { %v602_v8 = vpop.f32.mrb[12].mxu0 }
 0x135   : > { %v643_v9 = vpop.f32.mrb[12].mxu1  ;;  %v1589_v10 = vpack.c.bf16 %v602_v8, %v438_v42  ;;  %v604_v12 = vpop.f32.mrb[13].mxu0 }
 0x136   : > { %v1593_v11 = vpack.c.bf16 %v643_v9, %v479_v43  ;;  %v645_v13 = vpop.f32.mrb[13].mxu1  ;;  %v1590_v15 = vpack.c.bf16 %v604_v12, %v440_v44  ;;  %v606_v17 = vpop.f32.mrb[14].mxu0  ;;  %v1800_v12 = vld [vmem:[%s2309_s1] sm:$0xff]  }
 0x137   : > { %v1594_v16 = vpack.c.bf16 %v645_v13, %v481_v45  ;;  %v647_v18 = vpop.f32.mrb[14].mxu1  ;;  %v738_v21 = vrot.slane %v1589_v10, %v721_v7  ;;  %v607_v23 = vpop.f32.mrb[15].mxu0 }
 0x138   : > { %v806_v22 = vrot.slane %v1593_v11, %v721_v7  ;;  %v648_v24 = vpop.f32.mrb[15].mxu1  ;;  %v745_v27 = vrot.slane %v1590_v15, %v721_v7 }
 0x139   : > { %v813_v28 = vrot.slane %v1594_v16, %v721_v7  ;;  %v746_v29 = vcombine.low %v722_v19, %v738_v21  ;;  %v747_v30 = vcombine.high %v722_v19, %v738_v21 }
 0x13a   : > { %v814_v31 = vcombine.low %v790_v20, %v806_v22  ;;  %v815_v32 = vcombine.high %v790_v20, %v806_v22  ;;  %v762_v33 = vcombine.low %v729_v25, %v745_v27  ;;  %v763_v34 = vcombine.high %v729_v25, %v745_v27 }
 0x13b   : > { %v830_v35 = vcombine.low %v797_v26, %v813_v28  ;;  %v831_v36 = vcombine.high %v797_v26, %v813_v28  ;;  %v754_v37 = vrot.slane %v746_v29, %v753_v14  ;;  %v761_v38 = vrot.slane %v747_v30, %v753_v14 }
 0x13c   : > { %v822_v39 = vrot.slane %v814_v31, %v753_v14  ;;  %v829_v40 = vrot.slane %v815_v32, %v753_v14  ;;  %v770_v41 = vrot.slane %v762_v33, %v753_v14  ;;  %v777_v42 = vrot.slane %v763_v34, %v753_v14 }
 0x13d   : > { %v838_v43 = vrot.slane %v830_v35, %v753_v14  ;;  %v845_v44 = vrot.slane %v831_v36, %v753_v14 }
 0x13e   : > { %v778_v45 = vcombine.low %v754_v37, %v770_v41  ;;  %v779_v46 = vcombine.high %v754_v37, %v770_v41  ;;  %v780_v47 = vcombine.low %v761_v38, %v777_v42  ;;  %v781_v48 = vcombine.high %v761_v38, %v777_v42 }
 0x13f   : > { %v846_v49 = vcombine.low %v822_v39, %v838_v43  ;;  %v847_v50 = vcombine.high %v822_v39, %v838_v43  ;;  %v848_v51 = vcombine.low %v829_v40, %v845_v44  ;;  %v849_v52 = vcombine.high %v829_v40, %v845_v44 }
 0x140   : > { %v853_v53 = vshrl.u32 %v778_v45, 16  ;;  %v859_v54 = vshrl.u32 %v779_v46, 16  ;;  %v865_v55 = vshrl.u32 %v780_v47, 16  ;;  %v871_v56 = vshrl.u32 %v781_v48, 16 }
 0x141   : > { %v854_v57 = vshrl.u32 %v846_v49, 16  ;;  %v860_v58 = vshrl.u32 %v847_v50, 16  ;;  %v866_v59 = vshrl.u32 %v848_v51, 16  ;;  %v872_v60 = vshrl.u32 %v849_v52, 16 }
 0x142   : > { %v852_v61 = vpack.i.b16 %v846_v49, %v778_v45  ;;  %v858_v62 = vpack.i.b16 %v847_v50, %v779_v46  ;;  %v864_v63 = vpack.i.b16 %v848_v51, %v780_v47  ;;  %v870_v1 = vpack.i.b16 %v849_v52, %v781_v48 }
 0x143   : > { %v855_v2 = vpack.i.b16 %v854_v57, %v853_v53  ;;  %v861_v3 = vpack.i.b16 %v860_v58, %v859_v54  ;;  %v867_v4 = vpack.i.b16 %v866_v59, %v865_v55  ;;  %v873_v5 = vpack.i.b16 %v872_v60, %v871_v56 }
 0x144   : > { %v1597_v6 = vcombine.high %v852_v61, %v852_v61  ;;  %v1596_v7 = vcombine.low %v852_v61, %v852_v61  ;;  %v1605_v11 = vcombine.high %v858_v62, %v858_v62  ;;  %v1604_v13 = vcombine.low %v858_v62, %v858_v62 }
 0x145   : > { %v1601_v8 = vcombine.high %v855_v2, %v855_v2  ;;  %v1600_v9 = vcombine.low %v855_v2, %v855_v2  ;;  %v1609_v15 = vcombine.high %v861_v3, %v861_v3  ;;  %v1608_v16 = vcombine.low %v861_v3, %v861_v3 }
 0x146   : > { %1598 = vmatprep.subr.msk.bf16.mxu0 %vm273_vm0, %v1597_v6  ;;  %v889_v10 = vsel %vm273_vm0, %v1596_v7, 0  ;;  %v995_v17 = vsel %vm273_vm0, %v1604_v13, 0  ;;  %v1613_v18 = vcombine.high %v864_v63, %v864_v63  ;;  %v1617_v20 = vcombine.high %v867_v4, %v867_v4 }
 0x147   : > { %895 = vmatpush1.bf16.msra.mxu0 %v889_v10  ;;  %1602 = vmatprep.subr.msk.bf16.mxu1 %vm273_vm0, %v1601_v8  ;;  %v942_v14 = vsel %vm273_vm0, %v1600_v9, 0  ;;  %v1048_v19 = vsel %vm273_vm0, %v1608_v16, 0  ;;  %v1612_v21 = vcombine.low %v864_v63, %v864_v63  ;;  %v1616_v22 = vcombine.low %v867_v4, %v867_v4 }
 0x148   : > { %1606 = vmatprep.subr.msk.bf16.mxu0 %vm273_vm0, %v1605_v11  ;;  %948 = vmatpush1.bf16.msra.mxu1 %v942_v14  ;;  %v1621_v24 = vcombine.high %v870_v1, %v870_v1  ;;  %v1625_v26 = vcombine.high %v873_v5, %v873_v5  ;;  %v1620_v27 = vcombine.low %v870_v1, %v870_v1 }
 0x149   : > { %1610 = vmatprep.subr.msk.bf16.mxu1 %vm273_vm0, %v1609_v15  ;;  %v1101_v23 = vsel %vm273_vm0, %v1612_v21, 0  ;;  %v1154_v25 = vsel %vm273_vm0, %v1616_v22, 0  ;;  %v1624_v28 = vcombine.low %v873_v5, %v873_v5 }
 0x14a   : > { %1599 = vmatmul.mubr.msk.bf16.vlgmr.msra.gmra.mrb[16].mxu0 %vm269_vm1, %v1800_v12  ;;  %v1207_v29 = vsel %vm273_vm0, %v1620_v27, 0 }
 0x14b   : > { %1001 = vmatpush1.bf16.msra.mxu0 %v995_v17  ;;  %1603 = vmatmul.mubr.msk.bf16.vlgmr.msra.gmra.mrb[16].mxu1 %vm269_vm1, %v1800_v12  ;;  %v1260_v30 = vsel %vm273_vm0, %v1624_v28, 0 }
 0x14c   : > { %1614 = vmatprep.subr.msk.bf16.mxu0 %vm273_vm0, %v1613_v18  ;;  %1054 = vmatpush1.bf16.msra.mxu1 %v1048_v19 }
 0x14d   : > { %1618 = vmatprep.subr.msk.bf16.mxu1 %vm273_vm0, %v1617_v20  ;;  %1032 = vmatprep.mubr.bf16.mxu0 %v1956_v0 }
 0x14e   : > { %1085 = vmatprep.mubr.bf16.mxu1 %v1956_v0 }
 0x152   : > { %1607 = vmatmul.mubr.msk.bf16.vlgmr.msra.gmra.mrb[20].mxu0 %vm269_vm1, %v1800_v12 }
 0x153   : > { %1107 = vmatpush1.bf16.msra.mxu0 %v1101_v23  ;;  %1611 = vmatmul.mubr.msk.bf16.vlgmr.msra.gmra.mrb[20].mxu1 %vm269_vm1, %v1800_v12 }
 0x154   : > { %1622 = vmatprep.subr.msk.bf16.mxu0 %vm273_vm0, %v1621_v24  ;;  %1160 = vmatpush1.bf16.msra.mxu1 %v1154_v25 }
 0x155   : > { %1626 = vmatprep.subr.msk.bf16.mxu1 %vm273_vm0, %v1625_v26  ;;  %1138 = vmatprep.mubr.bf16.mxu0 %v1956_v0 }
 0x156   : > { %1191 = vmatprep.mubr.bf16.mxu1 %v1956_v0 }
 0x15a   : > { %1615 = vmatmul.mubr.msk.bf16.vlgmr.msra.gmra.mrb[24].mxu0 %vm269_vm1, %v1800_v12 }
 0x15b   : > { %1213 = vmatpush1.bf16.msra.mxu0 %v1207_v29  ;;  %1619 = vmatmul.mubr.msk.bf16.vlgmr.msra.gmra.mrb[24].mxu1 %vm269_vm1, %v1800_v12 }
 0x15c   : > { %1266 = vmatpush1.bf16.msra.mxu1 %v1260_v30  ;;  %1244 = vmatprep.mubr.bf16.mxu0 %v1956_v0 }
 0x15d   : > { %1297 = vmatprep.mubr.bf16.mxu1 %v1956_v0 }
 0x162   : > { %1623 = vmatmul.mubr.msk.bf16.vlgmr.msra.gmra.mrb[28].mxu0 %vm269_vm1, %v1800_v12 }
 0x163   : > { %1627 = vmatmul.mubr.msk.bf16.vlgmr.msra.gmra.mrb[28].mxu1 %vm269_vm1, %v1800_v12 }
 0x21d   : > { %v928_v31 = vpop.f32.mrb[16].mxu0 }
 0x21e   : > { %v981_v32 = vpop.f32.mrb[16].mxu1  ;;  %v930_v33 = vpop.f32.mrb[17].mxu0 }
 0x21f   : > { %v1660_v34 = vpack.c.bf16 %v930_v33, %v928_v31  ;;  %v983_v35 = vpop.f32.mrb[17].mxu1  ;;  %v932_v36 = vpop.f32.mrb[18].mxu0 }
 0x220   : > { %v1662_v37 = vpack.c.bf16 %v983_v35, %v981_v32  ;;  %v985_v38 = vpop.f32.mrb[18].mxu1  ;;  %v934_v39 = vpop.f32.mrb[19].mxu0 }
 0x221   : > { %1404 = vst [vmem:[%s2217_s28] sm:$0xff] %v1660_v34  ;;  %v1661_v0 = vpack.c.bf16 %v934_v39, %v932_v36  ;;  %v987_v40 = vpop.f32.mrb[19].mxu1 }
 0x222   : > { %1406 = vst [vmem:[%s2217_s28 + $0x10] sm:$0xff] %v1662_v37  ;;  %v1663_v41 = vpack.c.bf16 %v987_v40, %v985_v38 }
 0x223   : > { %1405 = vst [vmem:[%s2217_s28 + $0x8] sm:$0xff] %v1661_v0 }
 0x224   : > { %1407 = vst [vmem:[%s2217_s28 + $0x18] sm:$0xff] %v1663_v41 }
 0x225   : > { %v1034_v42 = vpop.f32.mrb[20].mxu0 }
 0x226   : > { %v1087_v43 = vpop.f32.mrb[20].mxu1  ;;  %v1036_v44 = vpop.f32.mrb[21].mxu0 }
 0x227   : > { %v1664_v45 = vpack.c.bf16 %v1036_v44, %v1034_v42  ;;  %v1089_v46 = vpop.f32.mrb[21].mxu1  ;;  %v1038_v47 = vpop.f32.mrb[22].mxu0 }
 0x228   : > { %v1666_v48 = vpack.c.bf16 %v1089_v46, %v1087_v43  ;;  %v1091_v49 = vpop.f32.mrb[22].mxu1  ;;  %v1040_v50 = vpop.f32.mrb[23].mxu0 }
 0x229   : > { %1408 = vst [vmem:[%s2217_s28 + $0x20] sm:$0xff] %v1664_v45  ;;  %v1665_v51 = vpack.c.bf16 %v1040_v50, %v1038_v47  ;;  %v1093_v52 = vpop.f32.mrb[23].mxu1 }
 0x22a   : > { %1410 = vst [vmem:[%s2217_s28 + $0x30] sm:$0xff] %v1666_v48  ;;  %v1667_v53 = vpack.c.bf16 %v1093_v52, %v1091_v49 }
 0x22b   : > { %1409 = vst [vmem:[%s2217_s28 + $0x28] sm:$0xff] %v1665_v51 }
 0x22c   : > { %1411 = vst [vmem:[%s2217_s28 + $0x38] sm:$0xff] %v1667_v53 }
 0x22d   : > { %v1140_v54 = vpop.f32.mrb[24].mxu0 }
 0x22e   : > { %v1193_v55 = vpop.f32.mrb[24].mxu1  ;;  %v1142_v56 = vpop.f32.mrb[25].mxu0 }
 0x22f   : > { %v1668_v57 = vpack.c.bf16 %v1142_v56, %v1140_v54  ;;  %v1195_v58 = vpop.f32.mrb[25].mxu1  ;;  %v1144_v59 = vpop.f32.mrb[26].mxu0 }
 0x230   : > { %v1670_v60 = vpack.c.bf16 %v1195_v58, %v1193_v55  ;;  %v1197_v61 = vpop.f32.mrb[26].mxu1  ;;  %v1146_v62 = vpop.f32.mrb[27].mxu0 }
 0x231   : > { %1412 = vst [vmem:[%s2217_s28 + $0x40] sm:$0xff] %v1668_v57  ;;  %v1669_v63 = vpack.c.bf16 %v1146_v62, %v1144_v59  ;;  %v1199_v1 = vpop.f32.mrb[27].mxu1 }
 0x232   : > { %1414 = vst [vmem:[%s2217_s28 + $0x50] sm:$0xff] %v1670_v60  ;;  %v1671_v2 = vpack.c.bf16 %v1199_v1, %v1197_v61 }
 0x233   : > { %1413 = vst [vmem:[%s2217_s28 + $0x48] sm:$0xff] %v1669_v63 }
 0x234   : > { %1415 = vst [vmem:[%s2217_s28 + $0x58] sm:$0xff] %v1671_v2 }
 0x235   : > { %v1246_v3 = vpop.f32.mrb[28].mxu0 }
 0x236   : > { %v1299_v4 = vpop.f32.mrb[28].mxu1  ;;  %v1248_v5 = vpop.f32.mrb[29].mxu0 }
 0x237   : > { %v1672_v6 = vpack.c.bf16 %v1248_v5, %v1246_v3  ;;  %v1301_v7 = vpop.f32.mrb[29].mxu1  ;;  %v1250_v8 = vpop.f32.mrb[30].mxu0 }
 0x238   : > { %v1674_v9 = vpack.c.bf16 %v1301_v7, %v1299_v4  ;;  %v1303_v10 = vpop.f32.mrb[30].mxu1  ;;  %v1252_v11 = vpop.f32.mrb[31].mxu0 }
 0x239   : > { %1416 = vst [vmem:[%s2217_s28 + $0x60] sm:$0xff] %v1672_v6  ;;  %v1673_v12 = vpack.c.bf16 %v1252_v11, %v1250_v8  ;;  %v1305_v13 = vpop.f32.mrb[31].mxu1 }
 0x23a   : > { %1418 = vst [vmem:[%s2217_s28 + $0x70] sm:$0xff] %v1674_v9  ;;  %v1675_v14 = vpack.c.bf16 %v1305_v13, %v1303_v10 }
 0x23b   : > { %1417 = vst [vmem:[%s2217_s28 + $0x68] sm:$0xff] %v1673_v12 }
 0x23c   : > { %1419 = vst [vmem:[%s2217_s28 + $0x78] sm:$0xff] %v1675_v14 }
 0x23d   : > { %1844 = shalt.err (!%p1841_p3)
}
 0x23e   : > { %s1845_s26 = scalar_lea.hbm %s2238_s24, 2048  ;;  %s1849_s6 = scalar_lea.hbm %s2311_s3, 8192 }
 0x23f   : > { %p1846_p13 = scmp.ne.s32.totalorder %s2238_s24, %s1845_s26  ;;  %p1850_p6 = scmp.lt.u32.totalorder %s2238_s24, %s2311_s3 }
 0x240   : > { %p1851_p9 = scmp.lt.u32.totalorder %s1849_s6, %s1845_s26  ;;  %p1853_p7 = scmp.lt.u32.totalorder %s1845_s26, %s2238_s24 }
 0x241   : > { %p1847_p0 = pnand %p1846_p13, %p2322_p2 }
 0x242   : > { %p1852_p12 = por %p1851_p9, %p1850_p6 }
 0x243   : > { %p1848_p5 = pneg %p1847_p0 }
 0x244   : > { %p1854_p4 = por %p1853_p7, %p1852_p12 }
 0x246   : > { %p1855_p11 = pnand %p1854_p4, %p1848_p5 }
 0x248   : > { %1858 = shalt.err (!%p1855_p11)
}
 0x249   : > { %s1960_s19 = smov 128   ;;  %s1961_s15 = smov 8  }
 0x24a   : > { %1679 = dma.vmem_to_hbm [thread:$0]  (%p2322_p2), %s2240_s4, 2048, %s2238_s24, %s2247_s29, %s1960_s19, %s1960_s19, %s1961_s15  }
 0x24b PF: > { %p1690_p1 = scmp.ge.s32.totalorder %s1953_s22, 2  ;;  %s1452_s5 = sand.u32 1, %s1913_s12  }
 0x24c   : > { %p2323_p8 = scmp.ne.s32.totalorder %s2318_s10, 0  ;;  %s1453_s23 = scalar_lea.sflag [#allocation4], %s1452_s5 }
 0x24e   : > { %p1686_p10 = pnand %p1690_p1, %p2323_p8 }
 0x250   : > { %1908 = dma.done.wait (!%p1686_p10), %s1453_s23, 2048  }
 0x251   : > { %1910 = vsyncadd (!%p1686_p10), %s1453_s23, 4294965248  ;;  %s19_s22 = sadd.s32 1, %s1953_s22   ;;  %s2324_s7 = sld [smem:[#allocation8_spill]] }
 0x252   : > { %p16_p3 = scmp.ge.s32.totalorder %s19_s22, 6   ;;  %s2325_s12 = smov %s1917_s13 }
 0x253   : > { %s2326_s13 = smov %s1921_s14  ;;  %s2327_s14 = smov %s2072_s9 }
 0x254   : > { %s2328_s15 = smov %s1929_s16  ;;  %s2329_s16 = smov %s1933_s17 }
 0x255   : > { %s2330_s17 = smov %s2069_s8  ;;  %s2331_s18 = smov %s1945_s20 }
 0x256   : > { %s2332_s19 = smov %s1949_s21  ;;  %s2333_s20 = smov %s2336_s25 }
 0x257   : > { %s2334_s21 = smov %s2324_s7  ;;  %18 = sbr.rel (!%p16_p3) target bundleno = 9 (0x9), region = 80 }
 0x25e   :  { %1458 = vsyncpa [#allocation3], 1 }
 0x25f   :  { %1460 = vsyncpa [#allocation3 + $0x1], 1 }
 0x260   :  { %1461 = vsyncpa [#allocation4], 1 }
 0x261   :  { %1463 = vsyncpa [#allocation4 + $0x1], 1 }

</bundles_post_ra>
